<compile_context>
chip_gen: v5e
topology: v5e:2x2
jax: 0.10.0
libtpu: 0.0.40
codegen_flags: <defaults>
</compile_context>

<pallas_src>
import jax
import jax.numpy as jnp
from jax.experimental import pallas as pl
from jax.experimental.pallas import tpu as pltpu


def _pca_noise_kernel(alpha_ref, eigval_ref, eigvec_ref, img_ref, out_ref):
    # alpha_ref, eigval_ref: (1, 3) f32 (row layout of the torch (3, 1) vectors)
    # eigvec_ref:            (3, 3) f32
    # img_ref / out_ref:     (TILE_B, 3, TILE_P)
    scaled = eigval_ref[...] * alpha_ref[...]                          # (1, 3)
    # noise[c] = sum_j eigvec[c, j] * (eigval[j] * alpha[j])  -> (3, 1)
    noise = jnp.sum(eigvec_ref[...] * scaled, axis=1, keepdims=True)
    noise = noise[None].astype(out_ref.dtype)                          # (1, 3, 1)
    out_ref[...] = img_ref[...] + noise


def _pick_tiles(batch: int, pixels: int, itemsize: int):
    # Lane tile: full width when small or not 128-divisible, else a 128-multiple
    # divisor capped at 2048 (keeps stores lane-dense and blocks comfortably
    # inside the v7x 32 MiB scoped-VMEM default even with double buffering).
    if pixels % 128 == 0 and pixels > 2048:
        tile_p = 2048
        while pixels % tile_p:
            tile_p -= 128
    else:
        tile_p = pixels
    # Batch tile: keep one block around <= ~2 MiB (3 rows pad to 8 sublanes).
    bytes_per_batch = 8 * tile_p * itemsize
    tile_b = max(1, min(batch, (2 << 20) // max(bytes_per_batch, 1)))
    while batch % tile_b:
        tile_b -= 1
    return tile_b, tile_p


def pca_random_noise(imgs: jax.Array, eigenvectors: jax.Array,
                     eigenvalues: jax.Array, alpha: jax.Array) -> jax.Array:
    """imgs: (B, 3, P); eigenvectors: (3, 3); eigenvalues: (3, 1); alpha: (3, 1).

    Returns imgs + eigenvectors @ (eigenvalues * alpha), broadcast over (B, ., P).
    """
    batch, chans, pixels = imgs.shape
    assert chans == 3, "PCARandomNoise expects the 3-channel axis at dim -2"

    alpha_row = alpha.astype(jnp.float32).reshape(1, 3)
    eigval_row = eigenvalues.astype(jnp.float32).reshape(1, 3)
    eigvec = eigenvectors.astype(jnp.float32).reshape(3, 3)

    tile_b, tile_p = _pick_tiles(batch, pixels, imgs.dtype.itemsize)
    grid = (batch // tile_b, pixels // tile_p)

    in_specs = [
        pl.BlockSpec((1, 3), lambda b, p: (0, 0)),                    # alpha
        pl.BlockSpec((1, 3), lambda b, p: (0, 0)),                    # eigenvalues
        pl.BlockSpec((3, 3), lambda b, p: (0, 0)),                    # eigenvectors
        pl.BlockSpec((tile_b, 3, tile_p), lambda b, p: (b, 0, p)),    # imgs
    ]
    out_spec = pl.BlockSpec((tile_b, 3, tile_p), lambda b, p: (b, 0, p))

    return pl.pallas_call(
        _pca_noise_kernel,
        out_shape=jax.ShapeDtypeStruct(imgs.shape, imgs.dtype),
        grid_spec=pltpu.PrefetchScalarGridSpec(
            num_scalar_prefetch=0,
            grid=grid,
            in_specs=in_specs,
            out_specs=out_spec,
        ),
        compiler_params=pltpu.CompilerParams(
            dimension_semantics=("parallel", "parallel"),
        ),
    )(alpha_row, eigval_row, eigvec, imgs)


if __name__ == "__main__":
    key = jax.random.PRNGKey(0)
    k_img, k_vec, k_val, k_alpha = jax.random.split(key, 4)

    batch, chans, height, width = 2, 3, 16, 16
    pixels = height * width  # 256 -> lane-dense last dim
    imgs = jax.random.normal(k_img, (batch, chans, pixels), dtype=jnp.float32)
    eigenvectors = jax.random.normal(k_vec, (3, 3), dtype=jnp.float32)
    eigenvalues = jax.random.uniform(k_val, (3, 1), dtype=jnp.float32)
    # torch.normal(0, 0.01, (3, 1)) equivalent, drawn deterministically here.
    # TODO(synk): the in-module RNG draw is done wrapper-side with jax.random;
    # an in-kernel pltpu.stateful_normal draw would not match torch's global RNG.
    alpha = 0.01 * jax.random.normal(k_alpha, (3, 1), dtype=jnp.float32)

    out = pca_random_noise(imgs, eigenvectors, eigenvalues, alpha)
    out = jax.block_until_ready(out)

    noise = eigenvectors @ (eigenvalues * alpha)     # (3, 1)
    expected = imgs + noise                          # broadcast over (B, 3, P)

    assert out.shape == imgs.shape, out.shape
    assert out.dtype == imgs.dtype, out.dtype
    assert jnp.allclose(out, expected, atol=1e-6), "mismatch vs reference"

    print("KERNEL_OK")
</pallas_src>

<mosaic_0001>
module attributes {stable_mosaic.version = 11 : i64} {
  func.func @_pca_noise_kernel(%arg0: i32, %arg1: i32, %arg2: memref<1x3xf32, #tpu.memory_space<vmem>>, %arg3: memref<1x3xf32, #tpu.memory_space<vmem>>, %arg4: memref<3x3xf32, #tpu.memory_space<vmem>>, %arg5: memref<2x3x256xf32, #tpu.memory_space<vmem>>, %arg6: memref<2x3x256xf32, #tpu.memory_space<vmem>>) attributes {dimension_semantics = [#tpu.dimension_semantics<parallel>, #tpu.dimension_semantics<parallel>], iteration_bounds = array<i64: 1, 1>, scalar_prefetch = 0 : i64, scratch_operands = 0 : i64, tpu.core_type = #tpu.core_type<tc>, window_params = [{pipeline_mode = #tpu.pipeline_mode<synchronous>, transform_indices = @transform_0, window_bounds = array<i64: 1, 3>}, {pipeline_mode = #tpu.pipeline_mode<synchronous>, transform_indices = @transform_1, window_bounds = array<i64: 1, 3>}, {pipeline_mode = #tpu.pipeline_mode<synchronous>, transform_indices = @transform_2, window_bounds = array<i64: 3, 3>}, {transform_indices = @transform_3, window_bounds = array<i64: 2, 3, 256>}, {transform_indices = @transform_4, window_bounds = array<i64: 2, 3, 256>}]} {
    %c0 = arith.constant 0 : index
    %c0_0 = arith.constant 0 : index
    %0 = vector.load %arg3[%c0, %c0_0] : memref<1x3xf32, #tpu.memory_space<vmem>>, vector<1x3xf32>
    %c0_1 = arith.constant 0 : index
    %c0_2 = arith.constant 0 : index
    %1 = vector.load %arg2[%c0_1, %c0_2] : memref<1x3xf32, #tpu.memory_space<vmem>>, vector<1x3xf32>
    %2 = arith.mulf %0, %1 : vector<1x3xf32>
    %c0_3 = arith.constant 0 : index
    %c0_4 = arith.constant 0 : index
    %3 = vector.load %arg4[%c0_3, %c0_4] : memref<3x3xf32, #tpu.memory_space<vmem>>, vector<3x3xf32>
    %4 = vector.broadcast %2 : vector<1x3xf32> to vector<3x3xf32>
    %5 = arith.mulf %3, %4 : vector<3x3xf32>
    %cst = arith.constant dense<0.000000e+00> : vector<3xf32>
    %6 = vector.multi_reduction <add>, %5, %cst [1] : vector<3x3xf32> to vector<3xf32>
    %7 = vector.shape_cast %6 : vector<3xf32> to vector<3x1xf32>
    %8 = vector.shape_cast %7 : vector<3x1xf32> to vector<1x3x1xf32>
    %c0_5 = arith.constant 0 : index
    %c0_6 = arith.constant 0 : index
    %c0_7 = arith.constant 0 : index
    %9 = vector.load %arg5[%c0_5, %c0_6, %c0_7] : memref<2x3x256xf32, #tpu.memory_space<vmem>>, vector<2x3x256xf32>
    %10 = vector.broadcast %8 : vector<1x3x1xf32> to vector<2x3x256xf32>
    %11 = arith.addf %9, %10 : vector<2x3x256xf32>
    %c0_8 = arith.constant 0 : index
    %c0_9 = arith.constant 0 : index
    %c0_10 = arith.constant 0 : index
    %12 = vector.load %arg6[%c0_8, %c0_9, %c0_10] : memref<2x3x256xf32, #tpu.memory_space<vmem>>, vector<2x3x256xf32>
    tpu.vector_store %arg6[%c0_8, %c0_9, %c0_10], %11 {strides = array<i32>} : memref<2x3x256xf32, #tpu.memory_space<vmem>>, vector<2x3x256xf32>,
    return
  }
  func.func @transform_0(%arg0: i32, %arg1: i32) -> (i32, i32) {
    %c0_i32 = arith.constant 0 : i32
    %c0_i32_0 = arith.constant 0 : i32
    %c0_i32_1 = arith.constant 0 : i32
    return %c0_i32, %c0_i32_0 : i32, i32
  }
  func.func @transform_1(%arg0: i32, %arg1: i32) -> (i32, i32) {
    %c0_i32 = arith.constant 0 : i32
    %c0_i32_0 = arith.constant 0 : i32
    %c0_i32_1 = arith.constant 0 : i32
    return %c0_i32, %c0_i32_0 : i32, i32
  }
  func.func @transform_2(%arg0: i32, %arg1: i32) -> (i32, i32) {
    %c0_i32 = arith.constant 0 : i32
    %c0_i32_0 = arith.constant 0 : i32
    %c0_i32_1 = arith.constant 0 : i32
    return %c0_i32, %c0_i32_0 : i32, i32
  }
  func.func @transform_3(%arg0: i32, %arg1: i32) -> (i32, i32, i32) {
    %c0_i32 = arith.constant 0 : i32
    %c0_i32_0 = arith.constant 0 : i32
    return %arg0, %c0_i32, %arg1 : i32, i32, i32
  }
  func.func @transform_4(%arg0: i32, %arg1: i32) -> (i32, i32, i32) {
    %c0_i32 = arith.constant 0 : i32
    %c0_i32_0 = arith.constant 0 : i32
    return %arg0, %c0_i32, %arg1 : i32, i32, i32
  }
}

</mosaic_0001>

<bundles_post_ra>
// kernel: tpu_custom_call.1
= control target key start
LH: loop header
LB: loop body
LE: loop exit
PB: predicated region body
PF: predicated region fallthrough
CT: control target
= control target key end

     0   :  { %vm25_vm0 = vcmask 18432   ;;  %v46_v7 = vmov 839922192   ;;  %s93_s0 = inlined_call_operand.vmem [shape: f32[1,3], index: 0, kind: input, shape index: {}]   ;;  %s94_s1 = inlined_call_operand.vmem [shape: f32[1,3], index: 1, kind: input, shape index: {}]   ;;  %s95_s2 = inlined_call_operand.vmem [shape: f32[3,3], index: 2, kind: input, shape index: {}]   ;;  %s96_s3 = inlined_call_operand.vmem [shape: f32[2,3,256], index: 3, kind: input, shape index: {}]   ;;  %s97_s4 = inlined_call_operand.vmem [shape: f32[2,3,256], index: 4, kind: output, shape index: {}]  }
   0x1   :  { %v17_v0 = vld [vmem:[%s94_s1] sm:$0x1]  ;;  %v33_v8 = vunpack.c.l.s4 %v46_v7  ;;  %v30_v12 = vld [vmem:[%s96_s3 + $0x8] sm:$0x77] }
   0x2   :  { %v18_v1 = vld [vmem:[%s93_s0] sm:$0x1] }
   0x3   :  { %v19_v2 = vmul.f32 %v18_v1, %v17_v0  ;;  %v20_v3 = vld [vmem:[%s95_s2] sm:$0x7]  ;;  %v34_v9 = vunpack.c.0.s8 %v33_v8 }
   0x4   :  { %v29_v11 = vld [vmem:[%s96_s3] sm:$0x77] }
   0x5   :  { %v22_v4 = vperm.slane %v19_v2, 0 }
   0x7   :  { %v24_v5 = vmul.f32 %v22_v4, %v20_v3 }
   0x9   :  { %v26_v6 = vsel %vm25_vm0, %v24_v5, 0.0 }
   0xa   :  { %27 = vadd.xlane.f32.xlu0 %v26_v6 }
  0x7d   :  { %v28_v10 = vpop.xlane.xlu0 %27 }
  0x7e   :  { %v35_v13 = vperm.slane %v28_v10, %v34_v9 }
  0x80   :  { %v37_v14 = vadd.f32 %v35_v13, %v29_v11  ;;  %v38_v15 = vadd.f32 %v35_v13, %v30_v12 }
  0x82   :  { %39 = vst [vmem:[%s97_s4] sm:$0x77] %v37_v14 }
  0x83   :  { %40 = vst [vmem:[%s97_s4 + $0x8] sm:$0x77] %v38_v15 }

</bundles_post_ra>
